<compile_context>
chip_gen: v5e
topology: v5e:2x2
jax: 0.10.0
libtpu: 0.0.40
codegen_flags: <defaults>
</compile_context>

<pallas_src>
import jax
import jax.numpy as jnp
from jax.experimental import pallas as pl
from jax.experimental.pallas import tpu as pltpu


def _round_up(x: int, m: int) -> int:
    return (x + m - 1) // m * m


def _patch_embed_kernel(x_ref, w_ref, b_ref, o_ref):
    # (tm, K) @ (K, E) -> fp32 accumulate on the MXU, add bias, cast out.
    acc = jnp.dot(x_ref[...], w_ref[...], preferred_element_type=jnp.float32)
    o_ref[...] = (acc + b_ref[...]).astype(o_ref.dtype)


def _pick_tile_m(M: int, tm_req: int) -> int:
    # Aim for >= 8 grid steps (pipelined DMA/compute overlap; >= 4 per v7x
    # core) while keeping tm >= 128 so per-step overhead stays amortized.
    tm = min(tm_req, max(128, _round_up(pl.cdiv(M, 8), 8)))
    tm = min(tm, _round_up(M, 8))
    return max(tm, 8)


def patch_embed_3d(x, weight, bias, patch_size, *, tm=512,
                   compute_dtype=jnp.bfloat16, out_dtype=None):
    """x: (B, C, H, W, D); weight: (E, C, pH, pW, pD); bias: (E,).

    Returns (B, N, E) with N = (H//pH)*(W//pW)*(D//pD), matching
    Conv3d(stride=kernel) -> flatten(2) -> transpose(1, 2).  norm_layer=None.

    compute_dtype: dtype for the MXU matmul inputs (bf16 halves HBM traffic;
      accumulation is always fp32).  out_dtype: defaults to x.dtype.
    """
    B, C, H, W, D = x.shape
    E = weight.shape[0]
    pH, pW, pD = patch_size
    nH, nW, nD = H // pH, W // pW, D // pD
    N = nH * nW * nD
    K = C * pH * pW * pD
    M = B * N

    out_dtype = x.dtype if out_dtype is None else out_dtype
    in_bytes = jnp.dtype(compute_dtype).itemsize
    out_bytes = jnp.dtype(out_dtype).itemsize

    tm = _pick_tile_m(M, tm)
    grid = (pl.cdiv(M, tm),)   # partial last block masked by Pallas; no M pad

    # --- glue: cast first (halves any materialized bytes), then patchify ----
    xp = x.astype(compute_dtype)
    xp = xp.reshape(B, C, nH, pH, nW, pW, nD, pD)
    xp = xp.transpose(0, 2, 4, 6, 1, 3, 5, 7).reshape(M, K)

    # weight (E, C, pH, pW, pD) -> (K, E); bias -> (1, E) fp32.
    w2 = weight.transpose(1, 2, 3, 4, 0).reshape(K, E).astype(compute_dtype)
    b2 = bias.astype(jnp.float32).reshape(1, E)

    # --- VMEM budget & per-generation cap ------------------------------------
    vmem_needed = (
        2 * tm * K * in_bytes          # double-buffered x tile
        + 2 * K * E * in_bytes         # weight (constant index_map)
        + 2 * 8 * _round_up(E, 128) * 4  # bias tile (layout-padded)
        + 2 * tm * E * out_bytes       # double-buffered out tile
    )
    vmem_limit = None
    if vmem_needed > 12 * 1024 * 1024:  # above the small scoped defaults
        try:
            vmem_cap = int(pltpu.get_tpu_info().vmem_capacity_bytes)
        except Exception:
            vmem_cap = 64 * 1024 * 1024  # conservative (v7x per-TensorCore)
        vmem_limit = min(int(vmem_needed * 3 // 2),
                         vmem_cap * 3 // 4,
                         100 * 1024 * 1024)

    cost = pl.CostEstimate(
        flops=2 * M * K * E,
        transcendentals=0,
        bytes_accessed=(M * K * in_bytes + K * E * in_bytes + E * 4
                        + M * E * out_bytes),
    )

    out = pl.pallas_call(
        _patch_embed_kernel,
        out_shape=jax.ShapeDtypeStruct((M, E), out_dtype),
        grid_spec=pltpu.PrefetchScalarGridSpec(
            num_scalar_prefetch=0,
            grid=grid,
            in_specs=[
                pl.BlockSpec((tm, K), lambda i: (i, 0)),   # patch-row tile
                pl.BlockSpec((K, E), lambda i: (0, 0)),    # full weight (resident)
                pl.BlockSpec((1, E), lambda i: (0, 0)),    # bias row
            ],
            out_specs=pl.BlockSpec((tm, E), lambda i: (i, 0)),
        ),
        compiler_params=pltpu.CompilerParams(
            dimension_semantics=("parallel",),
            allow_input_fusion=[True, False, False],
            vmem_limit_bytes=vmem_limit,
        ),
        cost_estimate=cost,
    )(xp, w2, b2)

    # (M, E) -> (B, N, E): contiguous reshape, no copy, no slicing.
    return out.reshape(B, N, E)


if __name__ == "__main__":
    # Small, consistent config: img=(16,16,16), patch=(4,4,4), C=3, E=32, B=2.
    B, C = 2, 3
    H = Wd = Dd = 16
    patch = (4, 4, 4)
    E = 32

    key = jax.random.PRNGKey(0)
    kx, kw, kb = jax.random.split(key, 3)
    x = jax.random.normal(kx, (B, C, H, Wd, Dd), dtype=jnp.float32)
    # deterministic synthetic Conv3d parameters (shapes from nn.Conv3d)
    weight = jax.random.normal(kw, (E, C, *patch), dtype=jnp.float32) * 0.02
    bias = jax.random.normal(kb, (E,), dtype=jnp.float32) * 0.02

    out = patch_embed_3d(x, weight, bias, patch)
    out = jax.block_until_ready(out)

    # pure-JAX fp32 reference (strided conv == patchify + matmul)
    nH, nW, nD = H // patch[0], Wd // patch[1], Dd // patch[2]
    xp = x.reshape(B, C, nH, patch[0], nW, patch[1], nD, patch[2])
    xp = xp.transpose(0, 2, 4, 6, 1, 3, 5, 7).reshape(B, nH * nW * nD, -1)
    ref = jnp.einsum("bnk,ke->bne",
                     xp, weight.transpose(1, 2, 3, 4, 0).reshape(-1, E)) + bias

    assert out.shape == (B, nH * nW * nD, E), out.shape
    # bf16 matmul inputs + fp32 accumulation -> looser tolerance vs fp32 ref
    assert jnp.allclose(out, ref, atol=2e-2, rtol=2e-2), (
        float(jnp.max(jnp.abs(out - ref))))

    print("KERNEL_OK")
</pallas_src>

<mosaic_0001>
module attributes {stable_mosaic.version = 11 : i64} {
  func.func @_patch_embed_kernel(%arg0: i32, %arg1: memref<128x192xbf16, #tpu.memory_space<vmem>>, %arg2: memref<192x32xbf16, #tpu.memory_space<vmem>>, %arg3: memref<1x32xf32, #tpu.memory_space<vmem>>, %arg4: memref<128x32xf32, #tpu.memory_space<vmem>>) attributes {dimension_semantics = [#tpu.dimension_semantics<parallel>], iteration_bounds = array<i64: 1>, scalar_prefetch = 0 : i64, scratch_operands = 0 : i64, tpu.core_type = #tpu.core_type<tc>, window_params = [{transform_indices = @transform_0, window_bounds = array<i64: 128, 192>}, {pipeline_mode = #tpu.pipeline_mode<synchronous>, transform_indices = @transform_1, window_bounds = array<i64: 192, 32>}, {pipeline_mode = #tpu.pipeline_mode<synchronous>, transform_indices = @transform_2, window_bounds = array<i64: 1, 32>}, {transform_indices = @transform_3, window_bounds = array<i64: 128, 32>}]} {
    %c0 = arith.constant 0 : index
    %c0_0 = arith.constant 0 : index
    %0 = vector.load %arg1[%c0, %c0_0] : memref<128x192xbf16, #tpu.memory_space<vmem>>, vector<128x192xbf16>
    %c0_1 = arith.constant 0 : index
    %c0_2 = arith.constant 0 : index
    %1 = vector.load %arg2[%c0_1, %c0_2] : memref<192x32xbf16, #tpu.memory_space<vmem>>, vector<192x32xbf16>
    %cst = arith.constant dense<0.000000e+00> : vector<128x32xf32>
    %2 = tpu.matmul %0, %1, %cst {dimension_numbers = #tpu.dot_dimension_numbers<[1], [0], [0], [1], [0, 0, 1, 1], [], []>} : vector<128x192xbf16>, vector<192x32xbf16>, vector<128x32xf32> -> vector<128x32xf32>
    %c0_3 = arith.constant 0 : index
    %c0_4 = arith.constant 0 : index
    %3 = vector.load %arg3[%c0_3, %c0_4] : memref<1x32xf32, #tpu.memory_space<vmem>>, vector<1x32xf32>
    %4 = vector.broadcast %3 : vector<1x32xf32> to vector<128x32xf32>
    %5 = arith.addf %2, %4 : vector<128x32xf32>
    %c0_5 = arith.constant 0 : index
    %c0_6 = arith.constant 0 : index
    %6 = vector.load %arg4[%c0_5, %c0_6] : memref<128x32xf32, #tpu.memory_space<vmem>>, vector<128x32xf32>
    tpu.vector_store %arg4[%c0_5, %c0_6], %5 {strides = array<i32>} : memref<128x32xf32, #tpu.memory_space<vmem>>, vector<128x32xf32>,
    return
  }
  func.func @transform_0(%arg0: i32) -> (i32, i32) {
    %c0_i32 = arith.constant 0 : i32
    %c0_i32_0 = arith.constant 0 : i32
    return %arg0, %c0_i32 : i32, i32
  }
  func.func @transform_1(%arg0: i32) -> (i32, i32) {
    %c0_i32 = arith.constant 0 : i32
    %c0_i32_0 = arith.constant 0 : i32
    %c0_i32_1 = arith.constant 0 : i32
    return %c0_i32, %c0_i32_0 : i32, i32
  }
  func.func @transform_2(%arg0: i32) -> (i32, i32) {
    %c0_i32 = arith.constant 0 : i32
    %c0_i32_0 = arith.constant 0 : i32
    %c0_i32_1 = arith.constant 0 : i32
    return %c0_i32, %c0_i32_0 : i32, i32
  }
  func.func @transform_3(%arg0: i32) -> (i32, i32) {
    %c0_i32 = arith.constant 0 : i32
    %c0_i32_0 = arith.constant 0 : i32
    return %arg0, %c0_i32 : i32, i32
  }
}

</mosaic_0001>

<bundles_post_ra>
// kernel: tpu_custom_call.1
= control target key start
LH: loop header
LB: loop body
LE: loop exit
PB: predicated region body
PF: predicated region fallthrough
CT: control target
= control target key end

     0   :  { %vm203_vm0 = vcmask 523264   ;;  %vm326_vm1 = vcmask 261120   ;;  %s753_s1 = inlined_call_operand.vmem [shape: bf16[192,32], index: 1, kind: input, shape index: {}]   ;;  %s754_s0 = inlined_call_operand.vmem [shape: bf16[128,192], index: 0, kind: input, shape index: {}]   ;;  %s755_s2 = inlined_call_operand.vmem [shape: f32[1,32], index: 2, kind: input, shape index: {}]   ;;  %s756_s3 = inlined_call_operand.vmem [shape: f32[128,32], index: 3, kind: output, shape index: {}]  }
   0x1   :  { %v490_v0 = vld [vmem:[%s753_s1 + $0x38] sm:$0xff]  ;;  %v489_v2 = vld [vmem:[%s753_s1 + $0x30] sm:$0xff]  ;;  %v488_v4 = vld [vmem:[%s753_s1 + $0x28] sm:$0xff] }
   0x2   :  { %v494_v1 = vld [vmem:[%s753_s1 + $0x58] sm:$0xff]  ;;  %228 = vmatpush.bf16.msra.mxu0 %v490_v0  ;;  %495 = vmatpush.bf16.msra.mxu2 %v490_v0  ;;  %v493_v3 = vld [vmem:[%s753_s1 + $0x50] sm:$0xff]  ;;  %v492_v5 = vld [vmem:[%s753_s1 + $0x48] sm:$0xff] }
   0x3   :  { %281 = vmatpush.bf16.msra.mxu1 %v494_v1  ;;  %503 = vmatpush.bf16.msra.mxu3 %v494_v1  ;;  %v487_v6 = vld [vmem:[%s753_s1 + $0x20] sm:$0xff]  ;;  %v351_v9 = vld [vmem:[%s754_s0 + $0x8] sm:$0xf0]  ;;  %v477_v10 = vld [vmem:[%s754_s0 + $0x54] sm:$0xf] }
   0x4   :  { %v491_v7 = vld [vmem:[%s753_s1 + $0x40] sm:$0xff]  ;;  %v391_v11 = vld [vmem:[%s754_s0 + $0x58] sm:$0xf0]  ;;  %v485_v15 = vld [vmem:[%s753_s1 + $0x10] sm:$0xff] }
   0x5   :  { %v467_v8 = vld [vmem:[%s754_s0 + $0x4] sm:$0xf]  ;;  %v486_v13 = vld [vmem:[%s753_s1 + $0x18] sm:$0xff]  ;;  %v394_v14 = vor.u32 %v477_v10, %v391_v11  ;;  %v484_v16 = vld [vmem:[%s753_s1 + $0x8] sm:$0xff] }
   0x6   :  { %229 = vmatpush.bf16.msra.mxu0 %v489_v2  ;;  %496 = vmatpush.bf16.msra.mxu2 %v489_v2  ;;  %v354_v12 = vor.u32 %v467_v8, %v351_v9  ;;  %v483_v17 = vld [vmem:[%s753_s1] sm:$0xff]  ;;  %v468_v19 = vld [vmem:[%s754_s0 + $0x4] sm:$0xf0]  ;;  %v469_v22 = vld [vmem:[%s754_s0 + $0x14] sm:$0xf] }
   0x7   :  { %282 = vmatpush.bf16.msra.mxu1 %v493_v3  ;;  %504 = vmatpush.bf16.msra.mxu3 %v493_v3  ;;  %v349_v18 = vld [vmem:[%s754_s0] sm:$0xf]  ;;  %v476_v21 = vld [vmem:[%s754_s0 + $0x44] sm:$0xf0]  ;;  %v359_v23 = vld [vmem:[%s754_s0 + $0x18] sm:$0xf0] }
   0x8   :  { %v381_v20 = vld [vmem:[%s754_s0 + $0x40] sm:$0xf]  ;;  %v479_v24 = vld [vmem:[%s754_s0 + $0x64] sm:$0xf]  ;;  %v399_v25 = vld [vmem:[%s754_s0 + $0x68] sm:$0xf0]  ;;  %v350_v26 = vor.u32 %v468_v19, %v349_v18  ;;  %v362_v28 = vor.u32 %v469_v22, %v359_v23 }
   0x9   :  { %v382_v27 = vor.u32 %v476_v21, %v381_v20  ;;  %v402_v29 = vor.u32 %v479_v24, %v399_v25  ;;  %v357_v30 = vld [vmem:[%s754_s0 + $0x10] sm:$0xf]  ;;  %v470_v31 = vld [vmem:[%s754_s0 + $0x14] sm:$0xf0]  ;;  %v471_v34 = vld [vmem:[%s754_s0 + $0x24] sm:$0xf] }
   0xa   :  { %230 = vmatpush.bf16.msra.mxu0 %v488_v4  ;;  %497 = vmatpush.bf16.msra.mxu2 %v488_v4  ;;  %v389_v32 = vld [vmem:[%s754_s0 + $0x50] sm:$0xf]  ;;  %v478_v33 = vld [vmem:[%s754_s0 + $0x54] sm:$0xf0]  ;;  %v367_v35 = vld [vmem:[%s754_s0 + $0x28] sm:$0xf0]  ;;  %v358_v38 = vor.u32 %v470_v31, %v357_v30 }
   0xb   :  { %283 = vmatpush.bf16.msra.mxu1 %v492_v5  ;;  %505 = vmatpush.bf16.msra.mxu3 %v492_v5  ;;  %v481_v36 = vld [vmem:[%s754_s0 + $0x74] sm:$0xf]  ;;  %v407_v37 = vld [vmem:[%s754_s0 + $0x78] sm:$0xf0]  ;;  %v390_v39 = vor.u32 %v478_v33, %v389_v32  ;;  %v370_v40 = vor.u32 %v471_v34, %v367_v35  ;;  %v365_v42 = vld [vmem:[%s754_s0 + $0x20] sm:$0xf] }
   0xc   :  { %v410_v41 = vor.u32 %v481_v36, %v407_v37  ;;  %v472_v43 = vld [vmem:[%s754_s0 + $0x24] sm:$0xf0]  ;;  %v397_v44 = vld [vmem:[%s754_s0 + $0x60] sm:$0xf]  ;;  %v473_v46 = vld [vmem:[%s754_s0 + $0x34] sm:$0xf] }
   0xd   :  { %v480_v45 = vld [vmem:[%s754_s0 + $0x64] sm:$0xf0]  ;;  %v375_v47 = vld [vmem:[%s754_s0 + $0x38] sm:$0xf0]  ;;  %v366_v48 = vor.u32 %v472_v43, %v365_v42  ;;  %v373_v51 = vld [vmem:[%s754_s0 + $0x30] sm:$0xf] }
   0xe   :  { %231 = vmatpush.bf16.msra.mxu0 %v487_v6  ;;  %498 = vmatpush.bf16.msra.mxu2 %v487_v6  ;;  %v398_v49 = vor.u32 %v480_v45, %v397_v44  ;;  %v378_v50 = vor.u32 %v473_v46, %v375_v47  ;;  %v474_v52 = vld [vmem:[%s754_s0 + $0x34] sm:$0xf0]  ;;  %v405_v53 = vld [vmem:[%s754_s0 + $0x70] sm:$0xf]  ;;  %v475_v55 = vld [vmem:[%s754_s0 + $0x44] sm:$0xf] }
   0xf   :  { %284 = vmatpush.bf16.msra.mxu1 %v491_v7  ;;  %506 = vmatpush.bf16.msra.mxu3 %v491_v7  ;;  %v482_v54 = vld [vmem:[%s754_s0 + $0x74] sm:$0xf0]  ;;  %v383_v56 = vld [vmem:[%s754_s0 + $0x48] sm:$0xf0]  ;;  %v374_v57 = vor.u32 %v474_v52, %v373_v51  ;;  %v671_v62 = vld [vmem:[%s755_s2] ss:$0 sm:$0xff] }
  0x10   :  { %v406_v58 = vor.u32 %v482_v54, %v405_v53  ;;  %v386_v59 = vor.u32 %v475_v55, %v383_v56 }
  0x12   :  { %459 = vmatmul.msk.bf16.vlgmr.msra.gmra.mxu1 %vm203_vm0, %v354_v12  ;;  %232 = vmatpush.bf16.msra.mxu0 %v486_v13 }
  0x13   :  { %499 = vmatpush.bf16.msra.mxu2 %v486_v13  ;;  %464 = vmatmul.msk.bf16.vlgmr.msra.gmra.mxu3 %vm203_vm0, %v394_v14 }
  0x16   :  { %233 = vmatpush.bf16.msra.mxu0 %v485_v15 }
  0x17   :  { %500 = vmatpush.bf16.msra.mxu2 %v485_v15 }
  0x1a   :  { %234 = vmatpush.bf16.msra.mxu0 %v484_v16 }
  0x1b   :  { %501 = vmatpush.bf16.msra.mxu2 %v484_v16 }
  0x1e   :  { %235 = vmatpush.bf16.msra.mxu0 %v483_v17 }
  0x1f   :  { %502 = vmatpush.bf16.msra.mxu2 %v483_v17 }
  0x21   :  { %236 = vmatmul.bf16.vlgmr.msra.gmra.mxu0 %v350_v26 }
  0x22   :  { %256 = vmatmul.bf16.vlgmr.msra.gmra.mxu2 %v382_v27  ;;  %460 = vmatmul.msk.bf16.gmra.mxu1 %vm203_vm0, %v362_v28 }
  0x23   :  { %465 = vmatmul.msk.bf16.gmra.mxu3 %vm203_vm0, %v402_v29 }
  0x31   :  { %241 = vmatmul.bf16.gmra.mxu0 %v358_v38 }
  0x32   :  { %261 = vmatmul.bf16.gmra.mxu2 %v390_v39  ;;  %461 = vmatmul.msk.bf16.gmra.mxu1 %vm203_vm0, %v370_v40 }
  0x33   :  { %466 = vmatmul.msk.bf16.gmra.mxu3 %vm203_vm0, %v410_v41 }
  0x41   :  { %246 = vmatmul.bf16.gmra.mxu0 %v366_v48 }
  0x42   :  { %266 = vmatmul.bf16.gmra.mxu2 %v398_v49  ;;  %462 = vmatmul.msk.bf16.gmra.mxu1 %vm203_vm0, %v378_v50 }
  0x51   :  { %251 = vmatmul.bf16.gmra.mxu0 %v374_v57 }
  0x52   :  { %271 = vmatmul.bf16.gmra.mxu2 %v406_v58  ;;  %463 = vmatmul.msk.bf16.gmra.mxu1 %vm203_vm0, %v386_v59 }
  0x8f   :  { %v286_v60 = vpop.f32.mrf.mxu1 }
  0x96   :  { %v311_v9 = vpop.f32.mrf.mxu3 }
  0x97   :  { %v288_v61 = vpop.f32.mrf.mxu1 }
  0x9e   :  { %v237_v63 = vpop.f32.mrf.mxu0  ;;  %v313_v19 = vpop.f32.mrf.mxu3 }
  0x9f   :  { %v238_v0 = vadd.f32 %v671_v62, %v237_v63  ;;  %v291_v1 = vpop.f32.mrf.mxu1 }
  0xa1   :  { %v287_v2 = vadd.f32 %v286_v60, %v238_v0 }
  0xa3   :  { %327 = vst.msk [vmem:[%s756_s3] sm:$0xff] %vm326_vm1, %v287_v2 }
  0xa5   :  { %v257_v3 = vpop.f32.mrf.mxu2 }
  0xa6   :  { %v239_v4 = vpop.f32.mrf.mxu0  ;;  %v316_v29 = vpop.f32.mrf.mxu3  ;;  %v258_v39 = vadd.f32 %v671_v62, %v257_v3 }
  0xa7   :  { %v240_v5 = vadd.f32 %v671_v62, %v239_v4  ;;  %v293_v6 = vpop.f32.mrf.mxu1 }
  0xa9   :  { %v289_v7 = vadd.f32 %v288_v61, %v240_v5 }
  0xab   :  { %328 = vst.msk [vmem:[%s756_s3 + $0x8] sm:$0xff] %vm326_vm1, %v289_v7 }
  0xad   :  { %v259_v8 = vpop.f32.mrf.mxu2 }
  0xae   :  { %v242_v10 = vpop.f32.mrf.mxu0  ;;  %v318_v37 = vpop.f32.mrf.mxu3  ;;  %v260_v49 = vadd.f32 %v671_v62, %v259_v8 }
  0xaf   :  { %v243_v11 = vadd.f32 %v671_v62, %v242_v10  ;;  %v296_v12 = vpop.f32.mrf.mxu1 }
  0xb1   :  { %v292_v13 = vadd.f32 %v291_v1, %v243_v11 }
  0xb3   :  { %329 = vst.msk [vmem:[%s756_s3 + $0x10] sm:$0xff] %vm326_vm1, %v292_v13 }
  0xb5   :  { %v262_v14 = vpop.f32.mrf.mxu2 }
  0xb6   :  { %v263_v15 = vadd.f32 %v671_v62, %v262_v14  ;;  %v244_v16 = vpop.f32.mrf.mxu0  ;;  %v321_v47 = vpop.f32.mrf.mxu3 }
  0xb7   :  { %v245_v17 = vadd.f32 %v671_v62, %v244_v16  ;;  %v298_v18 = vpop.f32.mrf.mxu1 }
  0xb8   :  { %v312_v20 = vadd.f32 %v311_v9, %v263_v15 }
  0xb9   :  { %v294_v21 = vadd.f32 %v293_v6, %v245_v17 }
  0xba   :  { %337 = vst.msk [vmem:[%s756_s3 + $0x50] sm:$0xff] %vm326_vm1, %v312_v20 }
  0xbb   :  { %330 = vst.msk [vmem:[%s756_s3 + $0x18] sm:$0xff] %vm326_vm1, %v294_v21 }
  0xbd   :  { %v264_v22 = vpop.f32.mrf.mxu2 }
  0xbe   :  { %v265_v23 = vadd.f32 %v671_v62, %v264_v22  ;;  %v247_v24 = vpop.f32.mrf.mxu0  ;;  %v323_v59 = vpop.f32.mrf.mxu3 }
  0xbf   :  { %v248_v25 = vadd.f32 %v671_v62, %v247_v24  ;;  %v301_v26 = vpop.f32.mrf.mxu1 }
  0xc0   :  { %v314_v27 = vadd.f32 %v313_v19, %v265_v23 }
  0xc1   :  { %v297_v28 = vadd.f32 %v296_v12, %v248_v25 }
  0xc2   :  { %338 = vst.msk [vmem:[%s756_s3 + $0x58] sm:$0xff] %vm326_vm1, %v314_v27 }
  0xc3   :  { %331 = vst.msk [vmem:[%s756_s3 + $0x20] sm:$0xff] %vm326_vm1, %v297_v28 }
  0xc5   :  { %v267_v30 = vpop.f32.mrf.mxu2 }
  0xc6   :  { %v268_v31 = vadd.f32 %v671_v62, %v267_v30  ;;  %v249_v32 = vpop.f32.mrf.mxu0 }
  0xc7   :  { %v250_v33 = vadd.f32 %v671_v62, %v249_v32  ;;  %v303_v34 = vpop.f32.mrf.mxu1 }
  0xc8   :  { %v317_v35 = vadd.f32 %v316_v29, %v268_v31 }
  0xc9   :  { %v299_v36 = vadd.f32 %v298_v18, %v250_v33 }
  0xca   :  { %339 = vst.msk [vmem:[%s756_s3 + $0x60] sm:$0xff] %vm326_vm1, %v317_v35 }
  0xcb   :  { %332 = vst.msk [vmem:[%s756_s3 + $0x28] sm:$0xff] %vm326_vm1, %v299_v36 }
  0xcd   :  { %v269_v38 = vpop.f32.mrf.mxu2 }
  0xce   :  { %v270_v40 = vadd.f32 %v671_v62, %v269_v38  ;;  %v252_v41 = vpop.f32.mrf.mxu0 }
  0xcf   :  { %v253_v42 = vadd.f32 %v671_v62, %v252_v41  ;;  %v306_v43 = vpop.f32.mrf.mxu1 }
  0xd0   :  { %v319_v44 = vadd.f32 %v318_v37, %v270_v40  ;;  %v307_v45 = vadd.f32 %v306_v43, %v258_v39 }
  0xd1   :  { %v302_v46 = vadd.f32 %v301_v26, %v253_v42 }
  0xd2   :  { %340 = vst.msk [vmem:[%s756_s3 + $0x68] sm:$0xff] %vm326_vm1, %v319_v44 }
  0xd3   :  { %333 = vst.msk [vmem:[%s756_s3 + $0x30] sm:$0xff] %vm326_vm1, %v302_v46 }
  0xd4   :  { %335 = vst.msk [vmem:[%s756_s3 + $0x40] sm:$0xff] %vm326_vm1, %v307_v45 }
  0xd5   :  { %v272_v48 = vpop.f32.mrf.mxu2 }
  0xd6   :  { %v273_v50 = vadd.f32 %v671_v62, %v272_v48  ;;  %v254_v51 = vpop.f32.mrf.mxu0 }
  0xd7   :  { %v255_v52 = vadd.f32 %v671_v62, %v254_v51  ;;  %v308_v53 = vpop.f32.mrf.mxu1 }
  0xd8   :  { %v322_v54 = vadd.f32 %v321_v47, %v273_v50  ;;  %v309_v55 = vadd.f32 %v308_v53, %v260_v49 }
  0xd9   :  { %v304_v56 = vadd.f32 %v303_v34, %v255_v52 }
  0xda   :  { %341 = vst.msk [vmem:[%s756_s3 + $0x70] sm:$0xff] %vm326_vm1, %v322_v54 }
  0xdb   :  { %334 = vst.msk [vmem:[%s756_s3 + $0x38] sm:$0xff] %vm326_vm1, %v304_v56 }
  0xdc   :  { %336 = vst.msk [vmem:[%s756_s3 + $0x48] sm:$0xff] %vm326_vm1, %v309_v55 }
  0xdd   :  { %v274_v57 = vpop.f32.mrf.mxu2 }
  0xde   :  { %v275_v58 = vadd.f32 %v671_v62, %v274_v57 }
  0xe0   :  { %v324_v60 = vadd.f32 %v323_v59, %v275_v58 }
  0xe2   :  { %342 = vst.msk [vmem:[%s756_s3 + $0x78] sm:$0xff] %vm326_vm1, %v324_v60 }

</bundles_post_ra>
